<compile_context>
chip_gen: v7x
topology: tpu7x:2x2x1
jax: 0.10.0
libtpu: 0.0.40
codegen_flags: <defaults>
</compile_context>

<pallas_src>
import functools

import jax
import jax.numpy as jnp
import numpy as np
from jax.experimental import pallas as pl
from jax.experimental.pallas import tpu as pltpu


def _fast_recip(d):
    """EUP approximate reciprocal + one Newton refinement (~f32 accuracy)."""
    r = pl.reciprocal(d, approx=True)
    return r * (jnp.float32(2.0) - d * r)


def _robust_sum_kernel(x_ref, w_ref, z_ref, *, K, norm, gamma, delta, epsilon, D1):
    # x_ref: (D1, 1) f32, w_ref: (D1, TILE_N) f32/bf16, z_ref: (1, TILE_N) f32
    x_col = x_ref[...]                           # (D1, 1)
    W = w_ref[...].astype(jnp.float32)           # upcast per-tile (bf16 transport OK)

    xw = x_col * W                               # (D1, TILE_N)
    z = jnp.sum(xw, axis=0, keepdims=True)       # (1, TILE_N) == matmul(x, W) tile

    if norm == "L2":
        z_ref[...] = z.astype(z_ref.dtype)
        return

    eps = jnp.float32(epsilon)
    one = jnp.float32(1.0)
    inv_D1 = jnp.float32(1.0 / float(D1))        # compile-time constant, no divide

    for _ in range(K):
        zb = z * inv_D1                          # (1, TILE_N), hoisted
        dist = jnp.abs(xw - zb)                  # (D1, TILE_N)
        r = _fast_recip(dist + eps)              # EUP reciprocal, not a VALU divide

        if norm == "L1":
            w = r
        elif norm == "MCP":
            w = r - jnp.float32(1.0 / gamma)
            w = jnp.maximum(w, eps)              # w[w < eps] = eps
        elif norm == "Huber":
            w = jnp.minimum(jnp.float32(delta) * r, one)          # w[w > 1] = 1
        elif norm == "HM":
            w = jnp.float32(delta / (gamma - delta)) * (jnp.float32(gamma) * r - one)
            w = jnp.minimum(w, one)              # w[w > 1] = 1
            w = jnp.maximum(w, eps)              # w[w < eps] = eps
        else:
            raise ValueError(f"unknown norm {norm!r}")

        # Hoisted F.normalize(w, p=1, dim=0):
        #   w >= eps > 0 for every norm, so sum(|w|) == sum(w); divide once per
        #   column ((1, TILE_N)) instead of per element ((D1, TILE_N)).
        denom = jnp.maximum(jnp.sum(w, axis=0, keepdims=True), jnp.float32(1e-12))
        s = jnp.sum(w * xw, axis=0, keepdims=True)                # (1, TILE_N)
        z = (jnp.float32(D1) * _fast_recip(denom)) * s            # (1, TILE_N)

    z_ref[...] = z.astype(z_ref.dtype)


def _round_up(n, m):
    return ((n + m - 1) // m) * m


def robust_sum(x, weight, *, K=3, norm="L2", gamma=4.0, delta=3.0, epsilon=1e-3,
               tile_n=None, force_pallas_l2=False):
    """Pallas implementation of RobustSum.forward(x, weight).

    x: (D1,) vector; weight: (D1, D2). Returns a (1, D2) float32 array.
    """
    weight = jnp.asarray(weight)
    D1, D2 = weight.shape
    x32 = jnp.asarray(x, jnp.float32).reshape(D1)

    if norm == "L2" and not force_pallas_l2:
        # Review item: XLA's GEMV is already optimal for the pure matmul path.
        return jnp.matmul(x32.reshape(1, D1), weight.astype(jnp.float32),
                          precision=jax.lax.Precision.HIGHEST)

    # Keep bf16 weights in bf16 for HBM transport (halves DMA bytes); all other
    # dtypes go through f32. Arithmetic inside the kernel is always f32.
    if weight.dtype != jnp.bfloat16:
        weight = weight.astype(jnp.float32)
    x_col = x32.reshape(D1, 1)

    # --- tile the (independent) D2 columns ---------------------------------
    if tile_n is None:
        # Keep each (D1, TILE_N) f32 temporary <= ~2 MiB so the working set
        # (double-buffered weight tile + a handful of f32 temporaries) stays
        # well inside the 32 MiB VMEM budget on v5e/v6e/v7x.
        budget_elems = (2 << 20) // (4 * D1)
        tile_n = max(128, min(2048, (budget_elems // 128) * 128))
    else:
        tile_n = max(128, _round_up(int(tile_n), 128))
    tile_n = min(tile_n, _round_up(D2, 128))
    d2_pad = _round_up(D2, tile_n)
    if d2_pad != D2:
        # Zero-padded columns are harmless: xw == 0 there, so z == 0 there.
        weight = jnp.pad(weight, ((0, 0), (0, d2_pad - D2)))

    grid = (d2_pad // tile_n,)
    kernel = functools.partial(
        _robust_sum_kernel, K=int(K), norm=norm, gamma=float(gamma),
        delta=float(delta), epsilon=float(epsilon), D1=D1)

    out = pl.pallas_call(
        kernel,
        out_shape=jax.ShapeDtypeStruct((1, d2_pad), jnp.float32),
        grid=grid,
        in_specs=[
            pl.BlockSpec((D1, 1), lambda j: (0, 0)),        # x column (revisited)
            pl.BlockSpec((D1, tile_n), lambda j: (0, j)),   # weight column tile
        ],
        out_specs=pl.BlockSpec((1, tile_n), lambda j: (0, j)),
        compiler_params=pltpu.CompilerParams(
            dimension_semantics=("parallel",),
            vmem_limit_bytes=32 << 20),
    )(x_col, weight)

    return out[:, :D2] if d2_pad != D2 else out


def _robust_sum_ref(x, weight, *, K=3, norm="L2", gamma=4.0, delta=3.0, epsilon=1e-3):
    """Pure-JAX reference mirroring the PyTorch forward, for verification."""
    weight = jnp.asarray(weight, jnp.float32)
    x = jnp.asarray(x, jnp.float32)
    D1 = weight.shape[0]
    z = jnp.matmul(x.reshape(1, -1), weight, precision=jax.lax.Precision.HIGHEST)
    if norm == "L2":
        return z
    xw = x.reshape(-1, 1) * weight
    for _ in range(K):
        dist = jnp.abs(xw - z / D1)
        if norm == "L1":
            w = 1.0 / (dist + epsilon)
        elif norm == "MCP":
            w = 1.0 / (dist + epsilon) - 1.0 / gamma
            w = jnp.where(w < epsilon, epsilon, w)
        elif norm == "Huber":
            w = delta / (dist + epsilon)
            w = jnp.where(w > 1.0, 1.0, w)
        elif norm == "HM":
            w = delta / (gamma - delta) * (gamma / (dist + epsilon) - 1.0)
            w = jnp.where(w > 1.0, 1.0, w)
            w = jnp.where(w < epsilon, epsilon, w)
        denom = jnp.maximum(jnp.sum(jnp.abs(w), axis=0, keepdims=True), 1e-12)
        z = D1 * jnp.sum((w / denom) * xw, axis=0, keepdims=True)
    return z


if __name__ == "__main__":
    # Deterministic synthetic inputs (no checkpoint loading).
    key = jax.random.PRNGKey(0)
    kx, kw = jax.random.split(key)
    D1, D2 = 32, 1024                       # small, lane-friendly shapes
    x = jax.random.normal(kx, (D1,), jnp.float32)
    weight = jax.random.normal(kw, (D1, D2), jnp.float32) * 0.1

    # Default module config: norm='L2' -> XLA GEMV fast path.
    out_l2_fast = robust_sum(x, weight, norm="L2")
    # L2 through the Pallas kernel as well (exercises the kernel's matmul path).
    out_l2_pallas = robust_sum(x, weight, norm="L2", force_pallas_l2=True)
    # Robust IRLS paths through the Pallas kernel; tile_n=256 -> 4-tile grid.
    out_l1 = robust_sum(x, weight, K=3, norm="L1", tile_n=256)
    out_mcp = robust_sum(x, weight, K=3, norm="MCP")
    out_hub = robust_sum(x, weight, K=3, norm="Huber", tile_n=256)
    out_hm = robust_sum(x, weight, K=3, norm="HM")
    # bf16 weight transport (upcast per-tile inside the kernel).
    w_bf16 = weight.astype(jnp.bfloat16)
    out_l1_bf16 = robust_sum(x, w_bf16, K=3, norm="L1")

    jax.block_until_ready((out_l2_fast, out_l2_pallas, out_l1, out_mcp,
                           out_hub, out_hm, out_l1_bf16))

    def check(got, want, tol):
        np.testing.assert_allclose(np.asarray(got), np.asarray(want),
                                   rtol=tol, atol=tol)

    check(out_l2_fast, _robust_sum_ref(x, weight, norm="L2"), 1e-5)
    check(out_l2_pallas, _robust_sum_ref(x, weight, norm="L2"), 1e-5)
    check(out_l1, _robust_sum_ref(x, weight, K=3, norm="L1"), 2e-4)
    check(out_mcp, _robust_sum_ref(x, weight, K=3, norm="MCP"), 2e-4)
    check(out_hub, _robust_sum_ref(x, weight, K=3, norm="Huber"), 2e-4)
    check(out_hm, _robust_sum_ref(x, weight, K=3, norm="HM"), 2e-4)
    check(out_l1_bf16,
          _robust_sum_ref(x, w_bf16.astype(jnp.float32), K=3, norm="L1"), 2e-4)

    print("KERNEL_OK")
</pallas_src>

<mosaic_0001>
module attributes {stable_mosaic.version = 11 : i64} {
  func.func @_robust_sum_kernel(%arg0: i32, %arg1: memref<32x1xf32, #tpu.memory_space<vmem>>, %arg2: memref<32x1024xf32, #tpu.memory_space<vmem>>, %arg3: memref<1x1024xf32, #tpu.memory_space<vmem>>) attributes {dimension_semantics = [#tpu.dimension_semantics<parallel>], iteration_bounds = array<i64: 1>, scalar_prefetch = 0 : i64, scratch_operands = 0 : i64, tpu.core_type = #tpu.core_type<tc>, window_params = [{pipeline_mode = #tpu.pipeline_mode<synchronous>, transform_indices = @transform_0, window_bounds = array<i64: 32, 1>}, {transform_indices = @transform_1, window_bounds = array<i64: 32, 1024>}, {transform_indices = @transform_2, window_bounds = array<i64: 1, 1024>}]} {
    %c0 = arith.constant 0 : index
    %c0_0 = arith.constant 0 : index
    %0 = vector.load %arg1[%c0, %c0_0] : memref<32x1xf32, #tpu.memory_space<vmem>>, vector<32x1xf32>
    %c0_1 = arith.constant 0 : index
    %c0_2 = arith.constant 0 : index
    %1 = vector.load %arg2[%c0_1, %c0_2] : memref<32x1024xf32, #tpu.memory_space<vmem>>, vector<32x1024xf32>
    %2 = vector.broadcast %0 : vector<32x1xf32> to vector<32x1024xf32>
    %3 = arith.mulf %2, %1 : vector<32x1024xf32>
    %cst = arith.constant dense<0.000000e+00> : vector<1024xf32>
    %4 = vector.multi_reduction <add>, %3, %cst [0] : vector<32x1024xf32> to vector<1024xf32>
    %5 = vector.shape_cast %4 : vector<1024xf32> to vector<1x1024xf32>
    %c0_3 = arith.constant 0 : index
    %c0_4 = arith.constant 0 : index
    %6 = vector.load %arg3[%c0_3, %c0_4] : memref<1x1024xf32, #tpu.memory_space<vmem>>, vector<1x1024xf32>
    tpu.vector_store %arg3[%c0_3, %c0_4], %5 {strides = array<i32>} : memref<1x1024xf32, #tpu.memory_space<vmem>>, vector<1x1024xf32>,
    return
  }
  func.func @transform_0(%arg0: i32) -> (i32, i32) {
    %c0_i32 = arith.constant 0 : i32
    %c0_i32_0 = arith.constant 0 : i32
    %c0_i32_1 = arith.constant 0 : i32
    return %c0_i32, %c0_i32_0 : i32, i32
  }
  func.func @transform_1(%arg0: i32) -> (i32, i32) {
    %c0_i32 = arith.constant 0 : i32
    %c0_i32_0 = arith.constant 0 : i32
    return %c0_i32, %arg0 : i32, i32
  }
  func.func @transform_2(%arg0: i32) -> (i32, i32) {
    %c0_i32 = arith.constant 0 : i32
    %c0_i32_0 = arith.constant 0 : i32
    return %c0_i32, %arg0 : i32, i32
  }
}

</mosaic_0001>

<bundles_post_ra>
// kernel: tpu_custom_call.1
= control target key start
LH: loop header
LB: loop body
LE: loop exit
PB: predicated region body
PF: predicated region fallthrough
CT: control target
= control target key end

     0   :  { %7 = vsyncpa [#allocation3], 0  ;;  %s381_s0 = inlined_call_operand.vmem [shape: f32[32,1], index: 0, kind: input, shape index: {}]   ;;  %s382_s1 = inlined_call_operand.hbm [shape: f32[32,1024], index: 1, kind: input, shape index: {}]   ;;  %s383_s2 = inlined_call_operand.hbm [shape: f32[1,1024], index: 2, kind: output, shape index: {}]  }
   0x1   :  { %8 = vsyncpa [#allocation4], 0  ;;  %s316_s9 = smov [#allocation2]   ;;  %s268_s13 = scalar_lea.hbm %s382_s1, 4096 }
   0x2   :  { %s16_s10 = sshll.u32 %s316_s9, 4  ;;  %p269_p0 = scmp.ne.s32.totalorder %s382_s1, %s268_s13  ;;  %s17_s10 = int_to_ptr.vmem [resolvable:$true] %s16_s10 }
   0x3   :  { %p272_p1 = scmp.lt.u32.totalorder %s268_s13, %s382_s1 }
   0x5   :  { %p274_p2 = pnand %p272_p1, %p269_p0 }
   0x7   :  { %277 = shalt.err (!%p274_p2)
}
   0x8   :  { %s278_s18 = scalar_lea.vmem %s17_s10, 4096  ;;  %p283_p4 = scmp.lt.s32.totalorder %s17_s10, %s17_s10 }
   0x9   :  { %p279_p3 = scmp.ne.s32.totalorder %s17_s10, %s278_s18  ;;  %p284_p5 = scmp.lt.s32.totalorder %s278_s18, %s278_s18 }
   0xb   :  { %p285_p6 = por %p284_p5, %p283_p4 }
   0xd   :  { %p286_p7 = pnand %p285_p6, %p279_p3 }
   0xf   :  { %289 = shalt.err (!%p286_p7)
}
  0x10   :  { %s317_s19 = smov 1024   ;;  %s318_s20 = smov 64  }
  0x11   :  { %22 = dma.hbm_to_vmem [thread:$0]  %s382_s1, 4096, %s17_s10, [#allocation3], %s317_s19, %s317_s19, %s318_s20  }
  0x12   :  { %312 = dma.done.wait [#allocation3], 4096  }
  0x13   :  { %313 = vsyncadd [#allocation3], 4294963200  ;;  %v319_v0 = vmov 0   ;;  %v28_v1 = vld [vmem:[%s381_s0 + $0x10] sm:$0xff]  ;;  %v26_v2 = vld [vmem:[%s381_s0] sm:$0xff]  ;;  %v201_v7 = vlaneseq }
  0x14   :  { %267 = vset.pattern.permute.xlu1 %v319_v0  ;;  %266 = vset.pattern.permute.xlu0 %v319_v0  ;;  %v29_v3 = vld [vmem:[%s381_s0 + $0x18] sm:$0xff]  ;;  %v27_v4 = vld [vmem:[%s381_s0 + $0x8] sm:$0xff]  ;;  %v320_v5 = vmov 1966171168   ;;  %v46_v8 = vld [vmem:[#allocation2 + $0x80] sm:$0xff]  ;;  %s321_s0 = smov [#allocation5]  }
  0x15   :  { %74 = vperm.xlu1 %267, %v28_v1   ;;  %64 = vperm.xlu0 %266, %v26_v2   ;;  %v199_v6 = vunpack.c.l.s4 %v320_v5  ;;  %v202_v10 = vshrl.u32 %v201_v7, 7  ;;  %v47_v11 = vld [vmem:[#allocation2 + $0x88] sm:$0xff]  ;;  %v48_v12 = vld [vmem:[#allocation2 + $0x90] sm:$0xff]  ;;  %v49_v13 = vld [vmem:[#allocation2 + $0x98] sm:$0xff]  ;;  %s251_s30 = sshll.u32 %s321_s0, 4  ;;  %s252_s30 = int_to_ptr.vmem [resolvable:$true] %s251_s30 }
  0x16   :  { %v50_v14 = vld [vmem:[#allocation2 + $0xa0] sm:$0xff]  ;;  %v51_v15 = vld [vmem:[#allocation2 + $0xa8] sm:$0xff]  ;;  %v52_v16 = vld [vmem:[#allocation2 + $0xb0] sm:$0xff]  ;;  %s290_s3 = scalar_lea.vmem %s252_s30, 128  ;;  %p295_p9 = scmp.lt.s32.totalorder %s252_s30, %s252_s30 }
  0x17   :  { %v200_v9 = vunpack.c.0.s8 %v199_v6  ;;  %v53_v17 = vld [vmem:[#allocation2 + $0xb8] sm:$0xff]  ;;  %v30_v18 = vld [vmem:[#allocation2] sm:$0xff]  ;;  %v31_v19 = vld [vmem:[#allocation2 + $0x8] sm:$0xff]  ;;  %p291_p8 = scmp.ne.s32.totalorder %s252_s30, %s290_s3  ;;  %p296_p10 = scmp.lt.s32.totalorder %s290_s3, %s290_s3 }
  0x18   :  { %v54_v22 = vld [vmem:[#allocation2 + $0xc0] sm:$0xff]  ;;  %v55_v23 = vld [vmem:[#allocation2 + $0xc8] sm:$0xff]  ;;  %v56_v24 = vld [vmem:[#allocation2 + $0xd0] sm:$0xff] }
  0x19   :  { %79 = vperm.xlu1 %267, %v29_v3   ;;  %69 = vperm.xlu0 %266, %v27_v4   ;;  %v57_v25 = vld [vmem:[#allocation2 + $0xd8] sm:$0xff]  ;;  %v32_v26 = vld [vmem:[#allocation2 + $0x10] sm:$0xff]  ;;  %v34_v28 = vld [vmem:[#allocation2 + $0x20] sm:$0xff]  ;;  %v361_v29 = vsub.s32 %v200_v9, %v202_v10  ;;  %p297_p11 = por %p296_p10, %p295_p9 }
  0x1a   :  { %v33_v27 = vld [vmem:[#allocation2 + $0x18] sm:$0xff]  ;;  %v35_v34 = vld [vmem:[#allocation2 + $0x28] sm:$0xff]  ;;  %v36_v35 = vld [vmem:[#allocation2 + $0x30] sm:$0xff] }
  0x1b   :  { %v37_v36 = vld [vmem:[#allocation2 + $0x38] sm:$0xff]  ;;  %v58_v41 = vld [vmem:[#allocation2 + $0xe0] sm:$0xff]  ;;  %v59_v42 = vld [vmem:[#allocation2 + $0xe8] sm:$0xff]  ;;  %p298_p12 = pnand %p297_p11, %p291_p8 }
  0x1c   :  { %v60_v43 = vld [vmem:[#allocation2 + $0xf0] sm:$0xff]  ;;  %v61_v44 = vld [vmem:[#allocation2 + $0xf8] sm:$0xff]  ;;  %v38_v45 = vld [vmem:[#allocation2 + $0x40] sm:$0xff] }
  0x1d   :  { %v39_v46 = vld [vmem:[#allocation2 + $0x48] sm:$0xff]  ;;  %v40_v52 = vld [vmem:[#allocation2 + $0x50] sm:$0xff]  ;;  %v41_v53 = vld [vmem:[#allocation2 + $0x58] sm:$0xff] }
  0x1e   :  { %v42_v54 = vld [vmem:[#allocation2 + $0x60] sm:$0xff]  ;;  %v43_v0 = vld [vmem:[#allocation2 + $0x68] sm:$0xff]  ;;  %v44_v1 = vld [vmem:[#allocation2 + $0x70] sm:$0xff] }
  0x1f   :  { %v45_v2 = vld [vmem:[#allocation2 + $0x78] sm:$0xff] }
  0x94   :  { %v75_v20 = vpop.permute.xlu1 %74  ;;  %v65_v21 = vpop.permute.xlu0 %64 }
  0x95   :  { %v98_v30 = vmul.f32 %v75_v20, %v46_v8  ;;  %v99_v31 = vmul.f32 %v75_v20, %v47_v11  ;;  %v100_v32 = vmul.f32 %v75_v20, %v48_v12  ;;  %v101_v33 = vmul.f32 %v75_v20, %v49_v13 }
  0x96   :  { %v102_v37 = vmul.f32 %v75_v20, %v50_v14  ;;  %v103_v38 = vmul.f32 %v75_v20, %v51_v15  ;;  %v104_v39 = vmul.f32 %v75_v20, %v52_v16  ;;  %v105_v40 = vmul.f32 %v75_v20, %v53_v17 }
  0x97   :  { %v82_v47 = vmul.f32 %v65_v21, %v30_v18  ;;  %v83_v48 = vmul.f32 %v65_v21, %v31_v19  ;;  %v84_v49 = vmul.f32 %v65_v21, %v32_v26  ;;  %v85_v50 = vmul.f32 %v65_v21, %v33_v27 }
  0x98   :  { %v80_v51 = vpop.permute.xlu1 %79  ;;  %v86_v55 = vmul.f32 %v65_v21, %v34_v28  ;;  %v87_v56 = vmul.f32 %v65_v21, %v35_v34  ;;  %v88_v57 = vmul.f32 %v65_v21, %v36_v35  ;;  %v89_v58 = vmul.f32 %v65_v21, %v37_v36  ;;  %v70_v59 = vpop.permute.xlu0 %69 }
  0x99   :  { %v106_v60 = vmul.f32 %v80_v51, %v54_v22  ;;  %v107_v61 = vmul.f32 %v80_v51, %v55_v23  ;;  %v108_v62 = vmul.f32 %v80_v51, %v56_v24  ;;  %v109_v63 = vmul.f32 %v80_v51, %v57_v25 }
  0x9a   :  { %v110_v3 = vmul.f32 %v80_v51, %v58_v41  ;;  %v111_v4 = vmul.f32 %v80_v51, %v59_v42  ;;  %v112_v5 = vmul.f32 %v80_v51, %v60_v43  ;;  %v113_v6 = vmul.f32 %v80_v51, %v61_v44 }
  0x9b   :  { %v90_v7 = vmul.f32 %v70_v59, %v38_v45  ;;  %v91_v8 = vmul.f32 %v70_v59, %v39_v46  ;;  %v92_v9 = vmul.f32 %v70_v59, %v40_v52  ;;  %v93_v10 = vmul.f32 %v70_v59, %v41_v53 }
  0x9c   :  { %v94_v11 = vmul.f32 %v70_v59, %v42_v54  ;;  %v95_v12 = vmul.f32 %v70_v59, %v43_v0  ;;  %v96_v13 = vmul.f32 %v70_v59, %v44_v1  ;;  %v97_v14 = vmul.f32 %v70_v59, %v45_v2 }
  0x9d   :  { %v114_v15 = vadd.f32 %v90_v7, %v82_v47  ;;  %v123_v16 = vadd.f32 %v91_v8, %v83_v48  ;;  %v132_v17 = vadd.f32 %v92_v9, %v84_v49  ;;  %v141_v18 = vadd.f32 %v93_v10, %v85_v50 }
  0x9e   :  { %v150_v19 = vadd.f32 %v94_v11, %v86_v55  ;;  %v159_v20 = vadd.f32 %v95_v12, %v87_v56  ;;  %v168_v21 = vadd.f32 %v96_v13, %v88_v57  ;;  %v177_v22 = vadd.f32 %v97_v14, %v89_v58 }
  0x9f   :  { %v115_v23 = vadd.f32 %v114_v15, %v98_v30  ;;  %v124_v24 = vadd.f32 %v123_v16, %v99_v31  ;;  %v133_v25 = vadd.f32 %v132_v17, %v100_v32  ;;  %v142_v26 = vadd.f32 %v141_v18, %v101_v33 }
  0xa0   :  { %v151_v27 = vadd.f32 %v150_v19, %v102_v37  ;;  %v160_v28 = vadd.f32 %v159_v20, %v103_v38  ;;  %v169_v34 = vadd.f32 %v168_v21, %v104_v39  ;;  %v178_v35 = vadd.f32 %v177_v22, %v105_v40 }
  0xa1   :  { %v116_v36 = vadd.f32 %v115_v23, %v106_v60  ;;  %v125_v41 = vadd.f32 %v124_v24, %v107_v61  ;;  %v134_v42 = vadd.f32 %v133_v25, %v108_v62  ;;  %v143_v43 = vadd.f32 %v142_v26, %v109_v63 }
  0xa2   :  { %v152_v44 = vadd.f32 %v151_v27, %v110_v3  ;;  %v161_v45 = vadd.f32 %v160_v28, %v111_v4  ;;  %v170_v46 = vadd.f32 %v169_v34, %v112_v5  ;;  %v179_v47 = vadd.f32 %v178_v35, %v113_v6 }
  0xa3   :  { %v117_v48 = vrot.slane %v116_v36, 4  ;;  %v126_v49 = vrot.slane %v125_v41, 4  ;;  %v135_v50 = vrot.slane %v134_v42, 4  ;;  %v144_v51 = vrot.slane %v143_v43, 4 }
  0xa4   :  { %v153_v30 = vrot.slane %v152_v44, 4  ;;  %v162_v31 = vrot.slane %v161_v45, 4  ;;  %v171_v32 = vrot.slane %v170_v46, 4  ;;  %v180_v33 = vrot.slane %v179_v47, 4 }
  0xa5   :  { %v118_v37 = vadd.f32 %v117_v48, %v116_v36  ;;  %v127_v38 = vadd.f32 %v126_v49, %v125_v41  ;;  %v136_v39 = vadd.f32 %v135_v50, %v134_v42  ;;  %v145_v40 = vadd.f32 %v144_v51, %v143_v43 }
  0xa6   :  { %v154_v52 = vadd.f32 %v153_v30, %v152_v44  ;;  %v163_v53 = vadd.f32 %v162_v31, %v161_v45  ;;  %v172_v54 = vadd.f32 %v171_v32, %v170_v46  ;;  %v181_v55 = vadd.f32 %v180_v33, %v179_v47 }
  0xa7   :  { %v119_v56 = vrot.slane %v118_v37, 2  ;;  %v128_v57 = vrot.slane %v127_v38, 2  ;;  %v137_v58 = vrot.slane %v136_v39, 2  ;;  %v146_v59 = vrot.slane %v145_v40, 2 }
  0xa8   :  { %v155_v60 = vrot.slane %v154_v52, 2  ;;  %v164_v61 = vrot.slane %v163_v53, 2  ;;  %v173_v62 = vrot.slane %v172_v54, 2  ;;  %v182_v63 = vrot.slane %v181_v55, 2 }
  0xa9   :  { %v120_v0 = vadd.f32 %v119_v56, %v118_v37  ;;  %v129_v1 = vadd.f32 %v128_v57, %v127_v38  ;;  %v138_v2 = vadd.f32 %v137_v58, %v136_v39  ;;  %v147_v3 = vadd.f32 %v146_v59, %v145_v40 }
  0xaa   :  { %v156_v4 = vadd.f32 %v155_v60, %v154_v52  ;;  %v165_v5 = vadd.f32 %v164_v61, %v163_v53  ;;  %v174_v6 = vadd.f32 %v173_v62, %v172_v54  ;;  %v183_v7 = vadd.f32 %v182_v63, %v181_v55 }
  0xab   :  { %v121_v8 = vrot.slane %v120_v0, 1  ;;  %v130_v9 = vrot.slane %v129_v1, 1  ;;  %v139_v10 = vrot.slane %v138_v2, 1  ;;  %v148_v11 = vrot.slane %v147_v3, 1 }
  0xac   :  { %v157_v12 = vrot.slane %v156_v4, 1  ;;  %v166_v13 = vrot.slane %v165_v5, 1  ;;  %v175_v14 = vrot.slane %v174_v6, 1  ;;  %v184_v15 = vrot.slane %v183_v7, 1 }
  0xad   :  { %v122_v16 = vadd.f32 %v121_v8, %v120_v0  ;;  %v131_v17 = vadd.f32 %v130_v9, %v129_v1  ;;  %v140_v18 = vadd.f32 %v139_v10, %v138_v2  ;;  %v149_v19 = vadd.f32 %v148_v11, %v147_v3 }
  0xae   :  { %v158_v20 = vadd.f32 %v157_v12, %v156_v4  ;;  %v167_v21 = vadd.f32 %v166_v13, %v165_v5  ;;  %v176_v22 = vadd.f32 %v175_v14, %v174_v6  ;;  %v185_v23 = vadd.f32 %v184_v15, %v183_v7 }
  0xaf   :  { %v194_v24 = vcombine.low %v122_v16, %v131_v17  ;;  %v195_v25 = vcombine.low %v140_v18, %v149_v19 }
  0xb0   :  { %v196_v26 = vcombine.low %v158_v20, %v167_v21  ;;  %v197_v27 = vcombine.low %v176_v22, %v185_v23 }
  0xb1   :  { %v204_v28 = vrot.slane %v194_v24, %v361_v29  ;;  %v211_v34 = vrot.slane %v195_v25, %v361_v29 }
  0xb2   :  { %v218_v35 = vrot.slane %v196_v26, %v361_v29  ;;  %v225_v36 = vrot.slane %v197_v27, %v361_v29 }
  0xb3   :  { %v226_v41 = vcombine.low %v204_v28, %v211_v34 }
  0xb4   :  { %v227_v42 = vcombine.low %v218_v35, %v225_v36 }
  0xb5   :  { %v234_v43 = vrot.slane %v226_v41, %v361_v29 }
  0xb6   :  { %v241_v44 = vrot.slane %v227_v42, %v361_v29 }
  0xb8   :  { %v242_v45 = vcombine.low %v234_v43, %v241_v44 }
  0xba   :  { %244 = vst [vmem:[#allocation5] sm:$0xff] %v242_v45 }
  0xbb   :  { %301 = shalt.err (!%p298_p12)
}
  0xbc   :  { %s302_s6 = scalar_lea.hbm %s383_s2, 128 }
  0xbd   :  { %p303_p13 = scmp.ne.s32.totalorder %s383_s2, %s302_s6  ;;  %p306_p0 = scmp.lt.u32.totalorder %s302_s6, %s383_s2 }
  0xbf   :  { %p308_p1 = pnand %p306_p0, %p303_p13 }
  0xc1   :  { %311 = shalt.err (!%p308_p1)
}
  0xc2   :  { %254 = dma.vmem_to_hbm [thread:$0]  %s252_s30, 128, %s383_s2, [#allocation4]  }
  0xc3   :  { %314 = dma.done.wait [#allocation4], 128  }
  0xc4   :  { %315 = vsyncadd [#allocation4], 4294967168 }
  0xc5   :  { %258 = vsyncpa [#allocation3], 1 }
  0xc6   :  { %259 = vsyncpa [#allocation4], 1 }

</bundles_post_ra>
